<compile_context>
chip_gen: v5e
topology: v5e:2x2
jax: 0.10.0
libtpu: 0.0.40
codegen_flags: <defaults>
</compile_context>

<pallas_src>
import functools

import jax
import jax.numpy as jnp
from jax.experimental import pallas as pl
from jax.experimental.pallas import tpu as pltpu


def _round_up(x, m):
    return (x + m - 1) // m * m


def _cdiv(a, b):
    return -(-a // b)


# ----------------------------------------------------------------------------
# Kernel
# ----------------------------------------------------------------------------
def _gated_prop_kernel(adj_in_ref, adj_out_ref, xin_ref, xout_ref, xc_ref,
                       w12_ref, w3zr_ref, wt3_ref, b_ref, out_ref):
    bblk, n, hp = xc_ref.shape
    m = bblk * n

    # --- per-graph message aggregation (bf16 operands, f32 accumulation) ----
    # TODO(synk): for very small N, pack the batch block into one
    # block-diagonal adjacency so the aggregation also runs as a single wide
    # matmul instead of b_blk tiny (N,NE)x(NE,Hp) matmuls.
    a_in = jnp.einsum("bnk,bkh->bnh", adj_in_ref[...], xin_ref[...],
                      preferred_element_type=jnp.float32)
    a_out = jnp.einsum("bnk,bkh->bnh", adj_out_ref[...], xout_ref[...],
                       preferred_element_type=jnp.float32)

    # Fold the batch block into the MXU M dimension; both halves are
    # lane-dense (Hp multiple of 128) so the lane concat is cheap and the
    # gate pre-activation is ONE wide matmul (single MXU stream).
    a = jnp.concatenate(
        [a_in.reshape(m, hp).astype(jnp.bfloat16),
         a_out.reshape(m, hp).astype(jnp.bfloat16)], axis=1)   # (M, 2Hp) bf16
    xc = xc_ref[...].reshape(m, hp)                            # (M, Hp)  f32
    xc_bf = xc.astype(jnp.bfloat16)

    # [a_in | a_out] @ [Wz | Wr | Wt] + [bz | br | bt]  -> (M, 3Hp) f32
    gates = jnp.dot(a, w12_ref[...],
                    preferred_element_type=jnp.float32) + b_ref[...]

    # x_curt contribution only for the z/r columns (the trans gate uses
    # r*x_curt, added below — no redundant xc@Wt MACs).
    zr = gates[:, :2 * hp] + jnp.dot(xc_bf, w3zr_ref[...],
                                     preferred_element_type=jnp.float32)

    # sigmoid(x) = 0.5*tanh(0.5*x) + 0.5 : a single EUP op per element.
    z = 0.5 * jnp.tanh(0.5 * zr[:, :hp]) + 0.5
    r = 0.5 * jnp.tanh(0.5 * zr[:, hp:]) + 0.5

    h_hat = jnp.tanh(gates[:, 2 * hp:]
                     + jnp.dot((r * xc).astype(jnp.bfloat16), wt3_ref[...],
                               preferred_element_type=jnp.float32))

    out = xc + z * (h_hat - xc)              # == (1-z)*xc + z*h_hat, in f32
    out_ref[...] = out.reshape(bblk, n, hp).astype(out_ref.dtype)


# ----------------------------------------------------------------------------
# Parameter packing
# ----------------------------------------------------------------------------
def _pack_params(params, h, hp):
    """Fuse and lane-pad the gate weights for the kernel.

    Inputs (PyTorch nn.Linear layout, pre-transposed): wz/wr/wt (3H, H),
    bz/br/bt (1, H).  Row blocks of each weight: [a_in | a_out | x_curt].

    Returns bf16 W12 (2Hp, 3Hp) ([a_in|a_out] rows, [z|r|t] columns),
    W3zr (Hp, 2Hp) (x_curt rows, [z|r] columns), Wt3 (Hp, Hp) (r*x_curt rows
    of the trans gate), and the fused f32 bias (1, 3Hp).
    """
    wz, wr, wt = params["wz"], params["wr"], params["wt"]
    bz, br, bt = params["bz"], params["br"], params["bt"]

    padc = lambda w: jnp.pad(w, ((0, 0), (0, hp - h)))
    padr = lambda w, rows: jnp.pad(w, ((0, rows - w.shape[0]), (0, 0)))

    w_ain = jnp.concatenate([padc(wz[:h]), padc(wr[:h]), padc(wt[:h])], axis=1)
    w_aout = jnp.concatenate([padc(wz[h:2 * h]), padc(wr[h:2 * h]),
                              padc(wt[h:2 * h])], axis=1)
    w12 = jnp.concatenate([padr(w_ain, hp), padr(w_aout, hp)], axis=0)

    w3zr = padr(jnp.concatenate([padc(wz[2 * h:]), padc(wr[2 * h:])], axis=1),
                hp)
    wt3 = padr(padc(wt[2 * h:]), hp)
    b_all = jnp.concatenate([padc(bz), padc(br), padc(bt)], axis=1)

    bf = lambda w: w.astype(jnp.bfloat16)
    return bf(w12), bf(w3zr), bf(wt3), b_all.astype(jnp.float32)


# ----------------------------------------------------------------------------
# Generation-aware sizing
# ----------------------------------------------------------------------------
def _vmem_limit_bytes():
    """~75% of physical VMEM, capped at 100 MiB.

    v5e/v6e (128 MiB physical) -> ~96-100 MiB; v7x (64 MiB) -> ~48 MiB.
    Falls back to the v7x-safe figure if the query is unavailable.
    """
    cap = 64 * 1024 * 1024
    try:
        cap = int(pltpu.get_tpu_info().vmem_capacity_bytes)
    except Exception:
        pass
    return min(cap * 3 // 4, 100 * 1024 * 1024)


def _vmem_bytes(b_blk, n, ne, hp):
    """Rough VMEM footprint: double-buffered blocks + weights + f32 temps."""
    m = b_blk * n
    blocks = (2 * b_blk * n * ne * 2        # matrix_in + matrix_out  (bf16)
              + 2 * b_blk * ne * hp * 2     # x_in + x_out            (bf16)
              + 2 * b_blk * n * hp * 4)     # x_curt + output         (f32)
    weights = 18 * hp * hp + 12 * hp        # packed bf16 weights + f32 bias
    temps = 12 * m * hp * 4                 # gates/zr/z/r/h_hat/a live temps
    # Blocks and (conservatively) the constant weights are double-buffered.
    # TODO(synk): single-buffer the constant weight operands (pl.Buffered(1)
    # or a manual VMEM hoist) to halve the weight term on v7x's 64 MiB VMEM.
    return 2 * blocks + 2 * weights + temps


def _choose_batch_block(B, N, NE, Hp, vmem_limit, batch_block):
    """Batches per grid step: fill the MXU M dim (~512), keep >=2 grid steps
    when the batch allows it (v7x megacore / pipelining), and stay in VMEM."""
    if batch_block is not None:
        b_blk = max(1, min(B, int(batch_block)))
    else:
        b_fill = max(1, _cdiv(512, N))          # batches to reach M ~ 512
        if B > b_fill:
            b_blk = b_fill                      # >=2 grid steps, each M>=512
        elif B >= 2 and _cdiv(B, 2) * N >= 256:
            b_blk = _cdiv(B, 2)                 # 2 steps, each M >= 256
        else:
            b_blk = B                           # small batch: fill M first
    # Shrink until the estimated footprint fits the generation's VMEM budget.
    while b_blk > 1 and _vmem_bytes(b_blk, N, NE, Hp) > int(0.85 * vmem_limit):
        b_blk = (b_blk + 1) // 2
    return b_blk


# ----------------------------------------------------------------------------
# Wrapper
# ----------------------------------------------------------------------------
@functools.partial(jax.jit,
                   static_argnames=("b_blk", "vmem_limit", "padded_output"))
def _gated_propagation_impl(x_in, x_out, x_curt, matrix, params, *,
                            b_blk, vmem_limit, padded_output):
    h = params["wz"].shape[1]
    hp = _round_up(h, 128)
    B, N = x_curt.shape[:2]
    NE = x_in.shape[1]

    w12, w3zr, wt3, b_all = _pack_params(params, h, hp)

    def pad_lanes(x):
        pad = hp - x.shape[-1]
        return x if pad == 0 else jnp.pad(x, ((0, 0), (0, 0), (0, pad)))

    # Split the adjacency halves at the XLA level (free) so the kernel never
    # slices lanes at a non-128 offset.  bf16 adjacency is exact for 0/1
    # graphs but lossy for real-valued edge weights (hence 5e-2 tolerance).
    m_in = matrix[:, :, :NE].astype(jnp.bfloat16)
    m_out = matrix[:, :, NE:].astype(jnp.bfloat16)
    x_in_b = pad_lanes(x_in.astype(jnp.bfloat16))
    x_out_b = pad_lanes(x_out.astype(jnp.bfloat16))
    xc_p = pad_lanes(x_curt.astype(jnp.float32))

    # Zero-pad the batch so the last grid step never reads out-of-range rows.
    bp = _round_up(B, b_blk)
    if bp != B:
        padb = lambda x: jnp.pad(x, ((0, bp - B),) + ((0, 0),) * (x.ndim - 1))
        m_in, m_out = padb(m_in), padb(m_out)
        x_in_b, x_out_b, xc_p = padb(x_in_b), padb(x_out_b), padb(xc_p)

    grid = (bp // b_blk,)
    batch3 = lambda s: pl.BlockSpec(s, lambda b: (b, 0, 0))
    full2 = lambda s: pl.BlockSpec(s, lambda b: (0, 0))

    out = pl.pallas_call(
        _gated_prop_kernel,
        out_shape=jax.ShapeDtypeStruct((bp, N, hp), x_curt.dtype),
        grid_spec=pltpu.PrefetchScalarGridSpec(
            num_scalar_prefetch=0,
            grid=grid,
            in_specs=[
                batch3((b_blk, N, NE)),      # matrix_in   (bf16)
                batch3((b_blk, N, NE)),      # matrix_out  (bf16)
                batch3((b_blk, NE, hp)),     # x_in        (bf16, lane padded)
                batch3((b_blk, NE, hp)),     # x_out       (bf16, lane padded)
                batch3((b_blk, N, hp)),      # x_curt      (f32,  lane padded)
                full2((2 * hp, 3 * hp)),     # W12  ([a_in|a_out] x [z|r|t])
                full2((hp, 2 * hp)),         # W3zr (x_curt       x [z|r])
                full2((hp, hp)),             # Wt3  (r*x_curt     x   t)
                full2((1, 3 * hp)),          # fused bias (f32)
            ],
            out_specs=batch3((b_blk, N, hp)),
        ),
        compiler_params=pltpu.CompilerParams(
            dimension_semantics=("parallel",),   # megacore-shard batch axis
            vmem_limit_bytes=vmem_limit,
        ),
    )(m_in, m_out, x_in_b, x_out_b, xc_p, w12, w3zr, wt3, b_all)

    out = out[:B] if bp != B else out
    if not padded_output and hp != h:
        out = out[:, :, :h]                  # strip lane padding once
    return out


def gated_propagation(x_in, x_out, x_curt, matrix, params, *,
                      batch_block=None, padded_output=False):
    """Pallas implementation of GatedPropagation.forward.

    x_in, x_out : (B, n_node*n_edge, H)  (or already lane-padded to Hp)
    x_curt      : (B, n_node, H)         (or Hp-wide, for a padded recurrence)
    matrix      : (B, n_node, 2*n_node*n_edge)
    Returns (B, n_node, H), or (B, n_node, Hp) when padded_output=True so a
    GGNN step loop can feed it straight back as the next x_curt.
    """
    h = params["wz"].shape[1]
    hp = _round_up(h, 128)
    B, N = x_curt.shape[:2]
    NE = x_in.shape[1]
    assert matrix.shape == (B, N, 2 * NE)
    assert x_curt.shape[-1] in (h, hp) and x_in.shape[-1] in (h, hp)

    vmem_limit = _vmem_limit_bytes()
    b_blk = _choose_batch_block(B, N, NE, hp, vmem_limit, batch_block)
    return _gated_propagation_impl(
        x_in, x_out, x_curt, matrix, params,
        b_blk=b_blk, vmem_limit=vmem_limit, padded_output=padded_output)


# ----------------------------------------------------------------------------
# Reference & synthetic parameters
# ----------------------------------------------------------------------------
def _reference(x_in, x_out, x_curt, matrix, params):
    """Pure-JAX f32 reference mirroring the PyTorch forward."""
    NE = x_in.shape[1]
    m_in, m_out = matrix[:, :, :NE], matrix[:, :, NE:]
    a_in = jnp.einsum("bnk,bkh->bnh", m_in, x_in)
    a_out = jnp.einsum("bnk,bkh->bnh", m_out, x_out)
    a = jnp.concatenate([a_in, a_out, x_curt], axis=2)
    z = jax.nn.sigmoid(a @ params["wz"] + params["bz"][0])
    r = jax.nn.sigmoid(a @ params["wr"] + params["br"][0])
    joint = jnp.concatenate([a_in, a_out, r * x_curt], axis=2)
    h_hat = jnp.tanh(joint @ params["wt"] + params["bt"][0])
    return (1.0 - z) * x_curt + z * h_hat


def make_params(hidden_dim, key):
    """Deterministic synthetic parameters (PyTorch Linear shapes, pre-transposed)."""
    keys = jax.random.split(key, 6)
    scale = 1.0 / jnp.sqrt(3.0 * hidden_dim)

    # nn.Linear(3H, H): weight (H,3H) -> stored transposed (3H,H); bias -> (1,H)
    def lin(kw, kb):
        w = jax.random.uniform(kw, (3 * hidden_dim, hidden_dim),
                               jnp.float32, -scale, scale)
        b = jax.random.uniform(kb, (1, hidden_dim), jnp.float32, -scale, scale)
        return w, b

    wr, br = lin(keys[0], keys[1])
    wz, bz = lin(keys[2], keys[3])
    wt, bt = lin(keys[4], keys[5])
    return {"wr": wr, "br": br, "wz": wz, "bz": bz, "wt": wt, "bt": bt}


if __name__ == "__main__":
    B, hidden_dim, n_node, n_edge = 2, 32, 8, 2
    NE = n_node * n_edge

    key = jax.random.PRNGKey(0)
    k1, k2, k3, k4, kp = jax.random.split(key, 5)

    x_in = jax.random.normal(k1, (B, NE, hidden_dim), jnp.float32)
    x_out = jax.random.normal(k2, (B, NE, hidden_dim), jnp.float32)
    x_curt = jax.random.normal(k3, (B, n_node, hidden_dim), jnp.float32)
    matrix = jax.random.normal(k4, (B, n_node, 2 * NE), jnp.float32)
    params = make_params(hidden_dim, kp)

    out = gated_propagation(x_in, x_out, x_curt, matrix, params)
    out = jax.block_until_ready(out)

    ref = _reference(x_in, x_out, x_curt, matrix, params)
    assert out.shape == (B, n_node, hidden_dim)
    # bf16 MXU operands (incl. bf16 adjacency) -> relaxed tolerance vs f32 ref.
    max_err = float(jnp.max(jnp.abs(out - ref)))
    assert jnp.allclose(out, ref, atol=5e-2, rtol=5e-2), (
        "mismatch vs reference: max abs err = %f" % max_err)

    print("KERNEL_OK")
</pallas_src>

<mosaic_0001>
module attributes {stable_mosaic.version = 11 : i64} {
  func.func @_gated_prop_kernel(%arg0: i32, %arg1: memref<2x8x16xbf16, #tpu.memory_space<vmem>>, %arg2: memref<2x8x16xbf16, #tpu.memory_space<vmem>>, %arg3: memref<2x16x128xbf16, #tpu.memory_space<vmem>>, %arg4: memref<2x16x128xbf16, #tpu.memory_space<vmem>>, %arg5: memref<2x8x128xf32, #tpu.memory_space<vmem>>, %arg6: memref<256x384xbf16, #tpu.memory_space<vmem>>, %arg7: memref<128x256xbf16, #tpu.memory_space<vmem>>, %arg8: memref<128x128xbf16, #tpu.memory_space<vmem>>, %arg9: memref<1x384xf32, #tpu.memory_space<vmem>>, %arg10: memref<2x8x128xf32, #tpu.memory_space<vmem>>) attributes {dimension_semantics = [#tpu.dimension_semantics<parallel>], iteration_bounds = array<i64: 1>, scalar_prefetch = 0 : i64, scratch_operands = 0 : i64, tpu.core_type = #tpu.core_type<tc>, window_params = [{transform_indices = @transform_0, window_bounds = array<i64: 2, 8, 16>}, {transform_indices = @transform_1, window_bounds = array<i64: 2, 8, 16>}, {transform_indices = @transform_2, window_bounds = array<i64: 2, 16, 128>}, {transform_indices = @transform_3, window_bounds = array<i64: 2, 16, 128>}, {transform_indices = @transform_4, window_bounds = array<i64: 2, 8, 128>}, {pipeline_mode = #tpu.pipeline_mode<synchronous>, transform_indices = @transform_5, window_bounds = array<i64: 256, 384>}, {pipeline_mode = #tpu.pipeline_mode<synchronous>, transform_indices = @transform_6, window_bounds = array<i64: 128, 256>}, {pipeline_mode = #tpu.pipeline_mode<synchronous>, transform_indices = @transform_7, window_bounds = array<i64: 128, 128>}, {pipeline_mode = #tpu.pipeline_mode<synchronous>, transform_indices = @transform_8, window_bounds = array<i64: 1, 384>}, {transform_indices = @transform_9, window_bounds = array<i64: 2, 8, 128>}]} {
    %c0 = arith.constant 0 : index
    %c0_0 = arith.constant 0 : index
    %c0_1 = arith.constant 0 : index
    %0 = vector.load %arg1[%c0, %c0_0, %c0_1] : memref<2x8x16xbf16, #tpu.memory_space<vmem>>, vector<2x8x16xbf16>
    %c0_2 = arith.constant 0 : index
    %c0_3 = arith.constant 0 : index
    %c0_4 = arith.constant 0 : index
    %1 = vector.load %arg3[%c0_2, %c0_3, %c0_4] : memref<2x16x128xbf16, #tpu.memory_space<vmem>>, vector<2x16x128xbf16>
    "tpu.trace_start"() <{level = 10 : i32, message = "bnk,bkh->bnh"}> : () -> ()
    %cst = arith.constant dense<0.000000e+00> : vector<2x8x128xf32>
    %2 = tpu.matmul %0, %1, %cst {dimension_numbers = #tpu.dot_dimension_numbers<[2], [1], [1], [2], [0, 0, 0, 1, 1, 2], [0], [0]>} : vector<2x8x16xbf16>, vector<2x16x128xbf16>, vector<2x8x128xf32> -> vector<2x8x128xf32>
    "tpu.trace_stop"() : () -> ()
    %c0_5 = arith.constant 0 : index
    %c0_6 = arith.constant 0 : index
    %c0_7 = arith.constant 0 : index
    %3 = vector.load %arg2[%c0_5, %c0_6, %c0_7] : memref<2x8x16xbf16, #tpu.memory_space<vmem>>, vector<2x8x16xbf16>
    %c0_8 = arith.constant 0 : index
    %c0_9 = arith.constant 0 : index
    %c0_10 = arith.constant 0 : index
    %4 = vector.load %arg4[%c0_8, %c0_9, %c0_10] : memref<2x16x128xbf16, #tpu.memory_space<vmem>>, vector<2x16x128xbf16>
    "tpu.trace_start"() <{level = 10 : i32, message = "bnk,bkh->bnh"}> : () -> ()
    %cst_11 = arith.constant dense<0.000000e+00> : vector<2x8x128xf32>
    %5 = tpu.matmul %3, %4, %cst_11 {dimension_numbers = #tpu.dot_dimension_numbers<[2], [1], [1], [2], [0, 0, 0, 1, 1, 2], [0], [0]>} : vector<2x8x16xbf16>, vector<2x16x128xbf16>, vector<2x8x128xf32> -> vector<2x8x128xf32>
    "tpu.trace_stop"() : () -> ()
    %6 = vector.shape_cast %2 : vector<2x8x128xf32> to vector<16x128xf32>
    %7 = arith.truncf %6 : vector<16x128xf32> to vector<16x128xbf16>
    %8 = vector.shape_cast %5 : vector<2x8x128xf32> to vector<16x128xf32>
    %9 = arith.truncf %8 : vector<16x128xf32> to vector<16x128xbf16>
    %10 = tpu.concatenate %7, %9 in 1 : vector<16x128xbf16>, vector<16x128xbf16> -> vector<16x256xbf16>
    %c0_12 = arith.constant 0 : index
    %c0_13 = arith.constant 0 : index
    %c0_14 = arith.constant 0 : index
    %11 = vector.load %arg5[%c0_12, %c0_13, %c0_14] : memref<2x8x128xf32, #tpu.memory_space<vmem>>, vector<2x8x128xf32>
    %12 = vector.shape_cast %11 : vector<2x8x128xf32> to vector<16x128xf32>
    %13 = arith.truncf %12 : vector<16x128xf32> to vector<16x128xbf16>
    %c0_15 = arith.constant 0 : index
    %c0_16 = arith.constant 0 : index
    %14 = vector.load %arg6[%c0_15, %c0_16] : memref<256x384xbf16, #tpu.memory_space<vmem>>, vector<256x384xbf16>
    %cst_17 = arith.constant dense<0.000000e+00> : vector<16x384xf32>
    %15 = tpu.matmul %10, %14, %cst_17 {dimension_numbers = #tpu.dot_dimension_numbers<[1], [0], [0], [1], [0, 0, 1, 1], [], []>} : vector<16x256xbf16>, vector<256x384xbf16>, vector<16x384xf32> -> vector<16x384xf32>
    %c0_18 = arith.constant 0 : index
    %c0_19 = arith.constant 0 : index
    %16 = vector.load %arg9[%c0_18, %c0_19] : memref<1x384xf32, #tpu.memory_space<vmem>>, vector<1x384xf32>
    %17 = vector.broadcast %16 : vector<1x384xf32> to vector<16x384xf32>
    %18 = arith.addf %15, %17 : vector<16x384xf32>
    %19 = vector.extract_strided_slice %18 {offsets = [0, 0], sizes = [16, 256], strides = [1, 1]} : vector<16x384xf32> to vector<16x256xf32>
    %c0_20 = arith.constant 0 : index
    %c0_21 = arith.constant 0 : index
    %20 = vector.load %arg7[%c0_20, %c0_21] : memref<128x256xbf16, #tpu.memory_space<vmem>>, vector<128x256xbf16>
    %cst_22 = arith.constant dense<0.000000e+00> : vector<16x256xf32>
    %21 = tpu.matmul %13, %20, %cst_22 {dimension_numbers = #tpu.dot_dimension_numbers<[1], [0], [0], [1], [0, 0, 1, 1], [], []>} : vector<16x128xbf16>, vector<128x256xbf16>, vector<16x256xf32> -> vector<16x256xf32>
    %22 = arith.addf %19, %21 : vector<16x256xf32>
    %23 = vector.extract_strided_slice %22 {offsets = [0, 0], sizes = [16, 128], strides = [1, 1]} : vector<16x256xf32> to vector<16x128xf32>
    %cst_23 = arith.constant 5.000000e-01 : f32
    %24 = vector.broadcast %cst_23 : f32 to vector<16x128xf32>
    %25 = arith.mulf %24, %23 : vector<16x128xf32>
    %26 = math.tanh %25 : vector<16x128xf32>
    %cst_24 = arith.constant 5.000000e-01 : f32
    %27 = vector.broadcast %cst_24 : f32 to vector<16x128xf32>
    %28 = arith.mulf %27, %26 : vector<16x128xf32>
    %cst_25 = arith.constant 5.000000e-01 : f32
    %29 = vector.broadcast %cst_25 : f32 to vector<16x128xf32>
    %30 = arith.addf %28, %29 : vector<16x128xf32>
    %31 = vector.extract_strided_slice %22 {offsets = [0, 128], sizes = [16, 128], strides = [1, 1]} : vector<16x256xf32> to vector<16x128xf32>
    %cst_26 = arith.constant 5.000000e-01 : f32
    %32 = vector.broadcast %cst_26 : f32 to vector<16x128xf32>
    %33 = arith.mulf %32, %31 : vector<16x128xf32>
    %34 = math.tanh %33 : vector<16x128xf32>
    %cst_27 = arith.constant 5.000000e-01 : f32
    %35 = vector.broadcast %cst_27 : f32 to vector<16x128xf32>
    %36 = arith.mulf %35, %34 : vector<16x128xf32>
    %cst_28 = arith.constant 5.000000e-01 : f32
    %37 = vector.broadcast %cst_28 : f32 to vector<16x128xf32>
    %38 = arith.addf %36, %37 : vector<16x128xf32>
    %39 = vector.extract_strided_slice %18 {offsets = [0, 256], sizes = [16, 128], strides = [1, 1]} : vector<16x384xf32> to vector<16x128xf32>
    %40 = arith.mulf %38, %12 : vector<16x128xf32>
    %41 = arith.truncf %40 : vector<16x128xf32> to vector<16x128xbf16>
    %c0_29 = arith.constant 0 : index
    %c0_30 = arith.constant 0 : index
    %42 = vector.load %arg8[%c0_29, %c0_30] : memref<128x128xbf16, #tpu.memory_space<vmem>>, vector<128x128xbf16>
    %cst_31 = arith.constant dense<0.000000e+00> : vector<16x128xf32>
    %43 = tpu.matmul %41, %42, %cst_31 {dimension_numbers = #tpu.dot_dimension_numbers<[1], [0], [0], [1], [0, 0, 1, 1], [], []>} : vector<16x128xbf16>, vector<128x128xbf16>, vector<16x128xf32> -> vector<16x128xf32>
    %44 = arith.addf %39, %43 : vector<16x128xf32>
    %45 = math.tanh %44 : vector<16x128xf32>
    %46 = arith.subf %45, %12 : vector<16x128xf32>
    %47 = arith.mulf %30, %46 : vector<16x128xf32>
    %48 = arith.addf %12, %47 : vector<16x128xf32>
    %49 = vector.shape_cast %48 : vector<16x128xf32> to vector<2x8x128xf32>
    %c0_32 = arith.constant 0 : index
    %c0_33 = arith.constant 0 : index
    %c0_34 = arith.constant 0 : index
    %50 = vector.load %arg10[%c0_32, %c0_33, %c0_34] : memref<2x8x128xf32, #tpu.memory_space<vmem>>, vector<2x8x128xf32>
    tpu.vector_store %arg10[%c0_32, %c0_33, %c0_34], %49 {strides = array<i32>} : memref<2x8x128xf32, #tpu.memory_space<vmem>>, vector<2x8x128xf32>,
    return
  }
  func.func @transform_0(%arg0: i32) -> (i32, i32, i32) {
    %c0_i32 = arith.constant 0 : i32
    %c0_i32_0 = arith.constant 0 : i32
    %c0_i32_1 = arith.constant 0 : i32
    return %arg0, %c0_i32, %c0_i32_0 : i32, i32, i32
  }
  func.func @transform_1(%arg0: i32) -> (i32, i32, i32) {
    %c0_i32 = arith.constant 0 : i32
    %c0_i32_0 = arith.constant 0 : i32
    %c0_i32_1 = arith.constant 0 : i32
    return %arg0, %c0_i32, %c0_i32_0 : i32, i32, i32
  }
  func.func @transform_2(%arg0: i32) -> (i32, i32, i32) {
    %c0_i32 = arith.constant 0 : i32
    %c0_i32_0 = arith.constant 0 : i32
    %c0_i32_1 = arith.constant 0 : i32
    return %arg0, %c0_i32, %c0_i32_0 : i32, i32, i32
  }
  func.func @transform_3(%arg0: i32) -> (i32, i32, i32) {
    %c0_i32 = arith.constant 0 : i32
    %c0_i32_0 = arith.constant 0 : i32
    %c0_i32_1 = arith.constant 0 : i32
    return %arg0, %c0_i32, %c0_i32_0 : i32, i32, i32
  }
  func.func @transform_4(%arg0: i32) -> (i32, i32, i32) {
    %c0_i32 = arith.constant 0 : i32
    %c0_i32_0 = arith.constant 0 : i32
    %c0_i32_1 = arith.constant 0 : i32
    return %arg0, %c0_i32, %c0_i32_0 : i32, i32, i32
  }
  func.func @transform_5(%arg0: i32) -> (i32, i32) {
    %c0_i32 = arith.constant 0 : i32
    %c0_i32_0 = arith.constant 0 : i32
    %c0_i32_1 = arith.constant 0 : i32
    return %c0_i32, %c0_i32_0 : i32, i32
  }
  func.func @transform_6(%arg0: i32) -> (i32, i32) {
    %c0_i32 = arith.constant 0 : i32
    %c0_i32_0 = arith.constant 0 : i32
    %c0_i32_1 = arith.constant 0 : i32
    return %c0_i32, %c0_i32_0 : i32, i32
  }
  func.func @transform_7(%arg0: i32) -> (i32, i32) {
    %c0_i32 = arith.constant 0 : i32
    %c0_i32_0 = arith.constant 0 : i32
    %c0_i32_1 = arith.constant 0 : i32
    return %c0_i32, %c0_i32_0 : i32, i32
  }
  func.func @transform_8(%arg0: i32) -> (i32, i32) {
    %c0_i32 = arith.constant 0 : i32
    %c0_i32_0 = arith.constant 0 : i32
    %c0_i32_1 = arith.constant 0 : i32
    return %c0_i32, %c0_i32_0 : i32, i32
  }
  func.func @transform_9(%arg0: i32) -> (i32, i32, i32) {
    %c0_i32 = arith.constant 0 : i32
    %c0_i32_0 = arith.constant 0 : i32
    %c0_i32_1 = arith.constant 0 : i32
    return %arg0, %c0_i32, %c0_i32_0 : i32, i32, i32
  }
}

</mosaic_0001>

<bundles_post_ra>
// kernel: _gated_propagation_impl.1
= control target key start
LH: loop header
LB: loop body
LE: loop exit
PB: predicated region body
PF: predicated region fallthrough
CT: control target
= control target key end

     0   :  { %vm46_vm0 = vcmask 130048   ;;  %s1759_s0 = inlined_call_operand.vmem [shape: bf16[2,8,16], index: 0, kind: input, shape index: {}]   ;;  %s1760_s1 = inlined_call_operand.vmem [shape: bf16[2,8,16], index: 1, kind: input, shape index: {}]   ;;  %s1761_s2 = inlined_call_operand.vmem [shape: bf16[2,16,128], index: 2, kind: input, shape index: {}]   ;;  %s1762_s3 = inlined_call_operand.vmem [shape: bf16[2,16,128], index: 3, kind: input, shape index: {}]   ;;  %s1763_s4 = inlined_call_operand.vmem [shape: f32[2,8,128], index: 4, kind: input, shape index: {}]   ;;  %s1764_s5 = inlined_call_operand.vmem [shape: bf16[256,384], index: 5, kind: input, shape index: {}]   ;;  %s1765_s6 = inlined_call_operand.vmem [shape: bf16[128,256], index: 6, kind: input, shape index: {}]   ;;  %s1766_s7 = inlined_call_operand.vmem [shape: bf16[128,128], index: 7, kind: input, shape index: {}]   ;;  %s1767_s8 = inlined_call_operand.vmem [shape: f32[1,384], index: 8, kind: input, shape index: {}]   ;;  %s1768_s9 = inlined_call_operand.hbm [shape: f32[2,8,128], index: 9, kind: output, shape index: {}]  }
   0x1   :  { %v1129_v0 = vld [vmem:[%s1761_s2] sm:$0xff]  ;;  %v1132_v2 = vld [vmem:[%s1762_s3 + $0x8] sm:$0xff]  ;;  %v1179_v8 = vld [vmem:[%s1764_s5 + $0x170] sm:$0xf0] }
   0x2   :  { %v1131_v1 = vld [vmem:[%s1762_s3] sm:$0xff]  ;;  %57 = vmatpush.bf16.msra.mxu1 %v1129_v0  ;;  %v1130_v6 = vld [vmem:[%s1761_s2 + $0x8] sm:$0xff]  ;;  %129 = vmatpush.bf16.msra.mxu3 %v1132_v2  ;;  %v1025_v10 = vld [vmem:[%s1764_s5 + $0x174] sm:$0xf0] }
   0x3   :  { %v34_v3 = vld [vmem:[%s1759_s0] sm:$0xf]  ;;  %107 = vmatpush.bf16.msra.mxu2 %v1131_v1  ;;  %v86_v5 = vld [vmem:[%s1760_s1 + $0x4] sm:$0xf]  ;;  %v1023_v7 = vld [vmem:[%s1764_s5 + $0x168] sm:$0xf] }
   0x4   :  { %v85_v4 = vld [vmem:[%s1760_s1] sm:$0xf]  ;;  %v1178_v9 = vld [vmem:[%s1764_s5 + $0x16c] sm:$0xf]  ;;  %v1024_v11 = vor.u32 %v1179_v8, %v1023_v7  ;;  %v1011_v13 = vld [vmem:[%s1764_s5 + $0x150] sm:$0xf] }
   0x5   :  { %v1028_v12 = vor.u32 %v1178_v9, %v1025_v10  ;;  %v1176_v14 = vld [vmem:[%s1764_s5 + $0x158] sm:$0xf0]  ;;  %v1175_v15 = vld [vmem:[%s1764_s5 + $0x154] sm:$0xf]  ;;  %825 = vmatmul.msk.bf16.vlgmr.msra.gmra.mxu1 %vm46_vm0, %v34_v3  ;;  %v1013_v16 = vld [vmem:[%s1764_s5 + $0x15c] sm:$0xf0]  ;;  %840 = vmatmul.msk.bf16.vlgmr.msra.gmra.mxu3 %vm46_vm0, %v86_v5 }
   0x6   :  { %79 = vmatpush.bf16.msrb.mxu1 %v1130_v6  ;;  %835 = vmatmul.msk.bf16.vlgmr.msra.gmra.mxu2 %vm46_vm0, %v85_v4  ;;  %v1012_v17 = vor.u32 %v1176_v14, %v1011_v13  ;;  %v999_v18 = vld [vmem:[%s1764_s5 + $0x138] sm:$0xf]  ;;  %v1173_v19 = vld [vmem:[%s1764_s5 + $0x140] sm:$0xf0]  ;;  %v927_v20 = vld [vmem:[%s1764_s5 + $0xa8] sm:$0xf]  ;;  %v1016_v21 = vor.u32 %v1175_v15, %v1013_v16 }
   0x7   :  { %524 = vmatpush.bf16.msrb.mxu3 %v1028_v12  ;;  %v1155_v22 = vld [vmem:[%s1764_s5 + $0xb0] sm:$0xf0]  ;;  %v1154_v23 = vld [vmem:[%s1764_s5 + $0xac] sm:$0xf]  ;;  %v929_v24 = vld [vmem:[%s1764_s5 + $0xb4] sm:$0xf0]  ;;  %v1000_v31 = vor.u32 %v1173_v19, %v999_v18 }
   0x8   :  { %v1172_v25 = vld [vmem:[%s1764_s5 + $0x13c] sm:$0xf]  ;;  %v1001_v26 = vld [vmem:[%s1764_s5 + $0x144] sm:$0xf0]  ;;  %v928_v27 = vor.u32 %v1155_v22, %v927_v20  ;;  %v932_v28 = vor.u32 %v1154_v23, %v929_v24  ;;  %v915_v29 = vld [vmem:[%s1764_s5 + $0x90] sm:$0xf] }
   0x9   :  { %v1152_v30 = vld [vmem:[%s1764_s5 + $0x98] sm:$0xf0]  ;;  %v987_v32 = vld [vmem:[%s1764_s5 + $0x120] sm:$0xf]  ;;  %v1151_v34 = vld [vmem:[%s1764_s5 + $0x94] sm:$0xf]  ;;  %v1004_v36 = vor.u32 %v1172_v25, %v1001_v26 }
   0xa   :  { %496 = vmatpush.bf16.msra.mxu1 %v1024_v11  ;;  %482 = vmatpush.bf16.msra.mxu0 %v928_v27  ;;  %v916_v33 = vor.u32 %v1152_v30, %v915_v29  ;;  %v917_v35 = vld [vmem:[%s1764_s5 + $0x9c] sm:$0xf0]  ;;  %v1170_v37 = vld [vmem:[%s1764_s5 + $0x128] sm:$0xf0]  ;;  %v1169_v38 = vld [vmem:[%s1764_s5 + $0x124] sm:$0xf] }
   0xb   :  { %525 = vmatpush.bf16.msrb.mxu3 %v1016_v21  ;;  %510 = vmatpush.bf16.msrb.mxu2 %v932_v28  ;;  %v989_v39 = vld [vmem:[%s1764_s5 + $0x12c] sm:$0xf0]  ;;  %v920_v40 = vor.u32 %v1151_v34, %v917_v35  ;;  %v903_v41 = vld [vmem:[%s1764_s5 + $0x78] sm:$0xf]  ;;  %v1149_v42 = vld [vmem:[%s1764_s5 + $0x80] sm:$0xf0]  ;;  %v988_v45 = vor.u32 %v1170_v37, %v987_v32 }
   0xc   :  { %v1148_v43 = vld [vmem:[%s1764_s5 + $0x7c] sm:$0xf]  ;;  %v905_v44 = vld [vmem:[%s1764_s5 + $0x84] sm:$0xf0]  ;;  %v1167_v47 = vld [vmem:[%s1764_s5 + $0x110] sm:$0xf0]  ;;  %v904_v48 = vor.u32 %v1149_v42, %v903_v41  ;;  %v992_v49 = vor.u32 %v1169_v38, %v989_v39 }
   0xd   :  { %v975_v46 = vld [vmem:[%s1764_s5 + $0x108] sm:$0xf]  ;;  %v1166_v50 = vld [vmem:[%s1764_s5 + $0x10c] sm:$0xf]  ;;  %v908_v51 = vor.u32 %v1148_v43, %v905_v44  ;;  %v891_v52 = vld [vmem:[%s1764_s5 + $0x60] sm:$0xf] }
   0xe   :  { %497 = vmatpush.bf16.msra.mxu1 %v1012_v17  ;;  %483 = vmatpush.bf16.msra.mxu0 %v916_v33  ;;  %v1146_v53 = vld [vmem:[%s1764_s5 + $0x68] sm:$0xf0]  ;;  %v977_v54 = vld [vmem:[%s1764_s5 + $0x114] sm:$0xf0]  ;;  %v1145_v55 = vld [vmem:[%s1764_s5 + $0x64] sm:$0xf]  ;;  %v976_v58 = vor.u32 %v1167_v47, %v975_v46 }
   0xf   :  { %526 = vmatpush.bf16.msrb.mxu3 %v1004_v36  ;;  %511 = vmatpush.bf16.msrb.mxu2 %v920_v40  ;;  %v893_v56 = vld [vmem:[%s1764_s5 + $0x6c] sm:$0xf0]  ;;  %v35_v57 = vld [vmem:[%s1759_s0 + $0x4] sm:$0xf]  ;;  %v1164_v60 = vld [vmem:[%s1764_s5 + $0xf8] sm:$0xf0]  ;;  %v892_v61 = vor.u32 %v1146_v53, %v891_v52  ;;  %v980_v62 = vor.u32 %v1166_v50, %v977_v54 }
  0x10   :  { %v963_v59 = vld [vmem:[%s1764_s5 + $0xf0] sm:$0xf]  ;;  %v1163_v63 = vld [vmem:[%s1764_s5 + $0xf4] sm:$0xf]  ;;  %v896_v0 = vor.u32 %v1145_v55, %v893_v56  ;;  %v879_v1 = vld [vmem:[%s1764_s5 + $0x48] sm:$0xf] }
  0x11   :  { %v1143_v2 = vld [vmem:[%s1764_s5 + $0x50] sm:$0xf0]  ;;  %v965_v3 = vld [vmem:[%s1764_s5 + $0xfc] sm:$0xf0]  ;;  %v1142_v4 = vld [vmem:[%s1764_s5 + $0x4c] sm:$0xf]  ;;  %v964_v6 = vor.u32 %v1164_v60, %v963_v59 }
  0x12   :  { %498 = vmatpush.bf16.msra.mxu1 %v1000_v31  ;;  %484 = vmatpush.bf16.msra.mxu0 %v904_v48  ;;  %v881_v5 = vld [vmem:[%s1764_s5 + $0x54] sm:$0xf0]  ;;  %v1161_v8 = vld [vmem:[%s1764_s5 + $0xe0] sm:$0xf0]  ;;  %v880_v9 = vor.u32 %v1143_v2, %v879_v1 }
  0x13   :  { %527 = vmatpush.bf16.msrb.mxu3 %v992_v49  ;;  %512 = vmatpush.bf16.msrb.mxu2 %v908_v51  ;;  %v951_v7 = vld [vmem:[%s1764_s5 + $0xd8] sm:$0xf] }
  0x15   :  { %830 = vmatmul.msk.bf16.vlgmr.msrb.gmra.mxu1 %vm46_vm0, %v35_v57 }
  0x16   :  { %499 = vmatpush.bf16.msra.mxu1 %v988_v45  ;;  %485 = vmatpush.bf16.msra.mxu0 %v892_v61 }
  0x1a   :  { %500 = vmatpush.bf16.msra.mxu1 %v976_v58 }
  0x1b   :  { %14 = vsyncpa [#allocation3], 0  ;;  %528 = vmatpush.bf16.msrb.mxu3 %v980_v62  ;;  %v968_v10 = vor.u32 %v1163_v63, %v965_v3  ;;  %513 = vmatpush.bf16.msrb.mxu2 %v896_v0  ;;  %v1160_v11 = vld [vmem:[%s1764_s5 + $0xdc] sm:$0xf]  ;;  %v884_v12 = vor.u32 %v1142_v4, %v881_v5  ;;  %v867_v13 = vld [vmem:[%s1764_s5 + $0x30] sm:$0xf]  ;;  %v952_v18 = vor.u32 %v1161_v8, %v951_v7 }
  0x1c   :  { %v1140_v14 = vld [vmem:[%s1764_s5 + $0x38] sm:$0xf0]  ;;  %v953_v15 = vld [vmem:[%s1764_s5 + $0xe4] sm:$0xf0]  ;;  %v1139_v16 = vld [vmem:[%s1764_s5 + $0x34] sm:$0xf]  ;;  %486 = vmatpush.bf16.msra.mxu0 %v880_v9 }
  0x1d   :  { %v869_v17 = vld [vmem:[%s1764_s5 + $0x3c] sm:$0xf0]  ;;  %v868_v19 = vor.u32 %v1140_v14, %v867_v13  ;;  %v956_v20 = vor.u32 %v1160_v11, %v953_v15  ;;  %v1158_v22 = vld [vmem:[%s1764_s5 + $0xc8] sm:$0xf0]  ;;  %v1157_v23 = vld [vmem:[%s1764_s5 + $0xc4] sm:$0xf] }
  0x1e   :  { %501 = vmatpush.bf16.msra.mxu1 %v964_v6  ;;  %v939_v21 = vld [vmem:[%s1764_s5 + $0xc0] sm:$0xf]  ;;  %v872_v24 = vor.u32 %v1139_v16, %v869_v17  ;;  %v941_v25 = vld [vmem:[%s1764_s5 + $0xcc] sm:$0xf0]  ;;  %v1180_v27 = vld [vmem:[%s1764_s5 + $0x178] sm:$0xf0] }
  0x1f   :  { %529 = vmatpush.bf16.msrb.mxu3 %v968_v10  ;;  %514 = vmatpush.bf16.msrb.mxu2 %v884_v12  ;;  %v1031_v26 = vld [vmem:[%s1764_s5 + $0x170] sm:$0xf]  ;;  %v1195_v28 = vld [vmem:[%s1765_s6 + $0x74] sm:$0xf]  ;;  %v1093_v29 = vld [vmem:[%s1765_s6 + $0x78] sm:$0xf0]  ;;  %v940_v30 = vor.u32 %v1158_v22, %v939_v21  ;;  %v944_v31 = vor.u32 %v1157_v23, %v941_v25 }
  0x20   :  { %487 = vmatpush.bf16.msra.mxu0 %v868_v19  ;;  %v1032_v32 = vor.u32 %v1180_v27, %v1031_v26  ;;  %v1096_v33 = vor.u32 %v1195_v28, %v1093_v29  ;;  %v1019_v34 = vld [vmem:[%s1764_s5 + $0x158] sm:$0xf]  ;;  %v1177_v35 = vld [vmem:[%s1764_s5 + $0x160] sm:$0xf0]  ;;  %v1085_v38 = vld [vmem:[%s1765_s6 + $0x68] sm:$0xf0] }
  0x21   :  { %v1193_v36 = vld [vmem:[%s1765_s6 + $0x64] sm:$0xf]  ;;  %v1020_v37 = vor.u32 %v1177_v35, %v1019_v34  ;;  %v855_v39 = vld [vmem:[%s1764_s5 + $0x18] sm:$0xf]  ;;  %v1136_v43 = vld [vmem:[%s1764_s5 + $0x1c] sm:$0xf] }
  0x22   :  { %502 = vmatpush.bf16.msra.mxu1 %v952_v18  ;;  %v1137_v40 = vld [vmem:[%s1764_s5 + $0x20] sm:$0xf0]  ;;  %v1088_v41 = vor.u32 %v1193_v36, %v1085_v38  ;;  %v857_v44 = vld [vmem:[%s1764_s5 + $0x24] sm:$0xf0]  ;;  %v1007_v46 = vld [vmem:[%s1764_s5 + $0x140] sm:$0xf] }
  0x23   :  { %530 = vmatpush.bf16.msrb.mxu3 %v956_v20  ;;  %515 = vmatpush.bf16.msrb.mxu2 %v872_v24  ;;  %v856_v42 = vor.u32 %v1137_v40, %v855_v39  ;;  %v860_v45 = vor.u32 %v1136_v43, %v857_v44  ;;  %v1174_v47 = vld [vmem:[%s1764_s5 + $0x148] sm:$0xf0]  ;;  %v1191_v48 = vld [vmem:[%s1765_s6 + $0x54] sm:$0xf]  ;;  %v1077_v50 = vld [vmem:[%s1765_s6 + $0x58] sm:$0xf0] }
  0x24   :  { %v1008_v49 = vor.u32 %v1174_v47, %v1007_v46  ;;  %v843_v51 = vld [vmem:[%s1764_s5] sm:$0xf]  ;;  %v1134_v52 = vld [vmem:[%s1764_s5 + $0x8] sm:$0xf0]  ;;  %v1080_v53 = vor.u32 %v1191_v48, %v1077_v50  ;;  %v1133_v55 = vld [vmem:[%s1764_s5 + $0x4] sm:$0xf] }
  0x25   :  { %488 = vmatpush.bf16.msra.mxu0 %v856_v42  ;;  %v844_v54 = vor.u32 %v1134_v52, %v843_v51  ;;  %v845_v56 = vld [vmem:[%s1764_s5 + $0xc] sm:$0xf0]  ;;  %v1156_v59 = vld [vmem:[%s1764_s5 + $0xb8] sm:$0xf0]  ;;  %v1196_v61 = vld [vmem:[%s1765_s6 + $0x74] sm:$0xf0] }
  0x26   :  { %503 = vmatpush.bf16.msra.mxu1 %v940_v30  ;;  %v935_v57 = vld [vmem:[%s1764_s5 + $0xb0] sm:$0xf]  ;;  %v848_v58 = vor.u32 %v1133_v55, %v845_v56  ;;  %v995_v0 = vld [vmem:[%s1764_s5 + $0x128] sm:$0xf]  ;;  %v1171_v1 = vld [vmem:[%s1764_s5 + $0x130] sm:$0xf0] }
  0x27   :  { %531 = vmatpush.bf16.msrb.mxu3 %v944_v31  ;;  %516 = vmatpush.bf16.msrb.mxu2 %v860_v45  ;;  %v1091_v60 = vld [vmem:[%s1765_s6 + $0x70] sm:$0xf]  ;;  %v936_v62 = vor.u32 %v1156_v59, %v935_v57  ;;  %v1189_v2 = vld [vmem:[%s1765_s6 + $0x44] sm:$0xf]  ;;  %v996_v3 = vor.u32 %v1171_v1, %v995_v0  ;;  %v1069_v4 = vld [vmem:[%s1765_s6 + $0x48] sm:$0xf0] }
  0x28   :  { %v1092_v63 = vor.u32 %v1196_v61, %v1091_v60  ;;  %v1072_v5 = vor.u32 %v1189_v2, %v1069_v4  ;;  %v923_v6 = vld [vmem:[%s1764_s5 + $0x98] sm:$0xf]  ;;  %v1153_v7 = vld [vmem:[%s1764_s5 + $0xa0] sm:$0xf0]  ;;  %v1083_v8 = vld [vmem:[%s1765_s6 + $0x60] sm:$0xf] }
  0x29   :  { %489 = vmatpush.bf16.msra.mxu0 %v844_v54  ;;  %v924_v9 = vor.u32 %v1153_v7, %v923_v6  ;;  %v1194_v10 = vld [vmem:[%s1765_s6 + $0x64] sm:$0xf0]  ;;  %v983_v12 = vld [vmem:[%s1764_s5 + $0x110] sm:$0xf]  ;;  %v1168_v13 = vld [vmem:[%s1764_s5 + $0x118] sm:$0xf0] }
  0x2a   :  { %552 = vmatpush.bf16.msrb.mxu1 %v1032_v32  ;;  %v1084_v11 = vor.u32 %v1194_v10, %v1083_v8  ;;  %v1187_v14 = vld [vmem:[%s1765_s6 + $0x34] sm:$0xf]  ;;  %v984_v15 = vor.u32 %v1168_v13, %v983_v12  ;;  %v1061_v16 = vld [vmem:[%s1765_s6 + $0x38] sm:$0xf0]  ;;  %v911_v18 = vld [vmem:[%s1764_s5 + $0x80] sm:$0xf] }
  0x2b   :  { %676 = vmatpush.bf16.msra.mxu3 %v1096_v33  ;;  %517 = vmatpush.bf16.msrb.mxu2 %v848_v58  ;;  %v1064_v17 = vor.u32 %v1187_v14, %v1061_v16  ;;  %v1150_v19 = vld [vmem:[%s1764_s5 + $0x88] sm:$0xf0]  ;;  %v1075_v20 = vld [vmem:[%s1765_s6 + $0x50] sm:$0xf]  ;;  %v1192_v22 = vld [vmem:[%s1765_s6 + $0x54] sm:$0xf0] }
  0x2c   :  { %v912_v21 = vor.u32 %v1150_v19, %v911_v18  ;;  %v1076_v23 = vor.u32 %v1192_v22, %v1075_v20  ;;  %v971_v24 = vld [vmem:[%s1764_s5 + $0xf8] sm:$0xf]  ;;  %v1165_v25 = vld [vmem:[%s1764_s5 + $0x100] sm:$0xf0]  ;;  %v1053_v28 = vld [vmem:[%s1765_s6 + $0x28] sm:$0xf0] }
  0x2d   :  { %538 = vmatpush.bf16.msrb.mxu0 %v936_v62  ;;  %v1185_v26 = vld [vmem:[%s1765_s6 + $0x24] sm:$0xf]  ;;  %v972_v27 = vor.u32 %v1165_v25, %v971_v24  ;;  %v899_v30 = vld [vmem:[%s1764_s5 + $0x68] sm:$0xf]  ;;  %v1147_v31 = vld [vmem:[%s1764_s5 + $0x70] sm:$0xf0] }
  0x2e   :  { %553 = vmatpush.bf16.msrb.mxu1 %v1020_v37  ;;  %v1056_v29 = vor.u32 %v1185_v26, %v1053_v28  ;;  %v1067_v32 = vld [vmem:[%s1765_s6 + $0x40] sm:$0xf]  ;;  %v900_v33 = vor.u32 %v1147_v31, %v899_v30  ;;  %v1190_v34 = vld [vmem:[%s1765_s6 + $0x44] sm:$0xf0]  ;;  %v1162_v37 = vld [vmem:[%s1764_s5 + $0xe8] sm:$0xf0] }
  0x2f   :  { %677 = vmatpush.bf16.msra.mxu3 %v1088_v41  ;;  %662 = vmatpush.bf16.msra.mxu2 %v1092_v63  ;;  %v1068_v35 = vor.u32 %v1190_v34, %v1067_v32  ;;  %v959_v36 = vld [vmem:[%s1764_s5 + $0xe0] sm:$0xf]  ;;  %v1183_v38 = vld [vmem:[%s1765_s6 + $0x14] sm:$0xf]  ;;  %v1045_v40 = vld [vmem:[%s1765_s6 + $0x18] sm:$0xf0] }
  0x30   :  { %v960_v39 = vor.u32 %v1162_v37, %v959_v36  ;;  %v1048_v41 = vor.u32 %v1183_v38, %v1045_v40  ;;  %v887_v42 = vld [vmem:[%s1764_s5 + $0x50] sm:$0xf]  ;;  %v1144_v43 = vld [vmem:[%s1764_s5 + $0x58] sm:$0xf0]  ;;  %v1188_v46 = vld [vmem:[%s1765_s6 + $0x34] sm:$0xf0] }
  0x31   :  { %539 = vmatpush.bf16.msrb.mxu0 %v924_v9  ;;  %v1059_v44 = vld [vmem:[%s1765_s6 + $0x30] sm:$0xf]  ;;  %v888_v45 = vor.u32 %v1144_v43, %v887_v42  ;;  %v947_v48 = vld [vmem:[%s1764_s5 + $0xc8] sm:$0xf]  ;;  %v1181_v50 = vld [vmem:[%s1765_s6 + $0x4] sm:$0xf] }
  0x32   :  { %554 = vmatpush.bf16.msrb.mxu1 %v1008_v49  ;;  %v1060_v47 = vor.u32 %v1188_v46, %v1059_v44  ;;  %v1159_v49 = vld [vmem:[%s1764_s5 + $0xd0] sm:$0xf0]  ;;  %v1037_v52 = vld [vmem:[%s1765_s6 + $0x8] sm:$0xf0]  ;;  %v1141_v54 = vld [vmem:[%s1764_s5 + $0x40] sm:$0xf0] }
  0x33   :  { %678 = vmatpush.bf16.msra.mxu3 %v1080_v53  ;;  %663 = vmatpush.bf16.msra.mxu2 %v1084_v11  ;;  %v948_v51 = vor.u32 %v1159_v49, %v947_v48  ;;  %v875_v53 = vld [vmem:[%s1764_s5 + $0x38] sm:$0xf]  ;;  %v1040_v55 = vor.u32 %v1181_v50, %v1037_v52  ;;  %v1051_v57 = vld [vmem:[%s1765_s6 + $0x20] sm:$0xf]  ;;  %v1186_v58 = vld [vmem:[%s1765_s6 + $0x24] sm:$0xf0] }
  0x34   :  { %v876_v56 = vor.u32 %v1141_v54, %v875_v53  ;;  %v1052_v59 = vor.u32 %v1186_v58, %v1051_v57  ;;  %v863_v60 = vld [vmem:[%s1764_s5 + $0x20] sm:$0xf]  ;;  %v1138_v61 = vld [vmem:[%s1764_s5 + $0x28] sm:$0xf0]  ;;  %v1043_v62 = vld [vmem:[%s1765_s6 + $0x10] sm:$0xf] }
  0x35   :  { %540 = vmatpush.bf16.msrb.mxu0 %v912_v21  ;;  %v864_v63 = vor.u32 %v1138_v61, %v863_v60  ;;  %v1184_v0 = vld [vmem:[%s1765_s6 + $0x14] sm:$0xf0]  ;;  %v851_v1 = vld [vmem:[%s1764_s5 + $0x8] sm:$0xf]  ;;  %v1135_v2 = vld [vmem:[%s1764_s5 + $0x10] sm:$0xf0] }
  0x36   :  { %555 = vmatpush.bf16.msrb.mxu1 %v996_v3  ;;  %v1044_v4 = vor.u32 %v1184_v0, %v1043_v62  ;;  %v1182_v6 = vld [vmem:[%s1765_s6 + $0x4] sm:$0xf0]  ;;  %v852_v7 = vor.u32 %v1135_v2, %v851_v1  ;;  %v1714_v25 = vld [vmem:[%s1763_s4] sm:$0xff]  ;;  %v1203_v30 = vld [vmem:[%s1766_s7 + $0x30] sm:$0xff]  ;;  %s809_s29 = sshll.u32 %s1768_s9, 4  ;;  %s1247_s0 = smov 128   ;;  %s810_s29 = int_to_ptr.hbm [resolvable:$true] %s809_s29 }
  0x37   :  { %679 = vmatpush.bf16.msra.mxu3 %v1072_v5  ;;  %664 = vmatpush.bf16.msra.mxu2 %v1076_v23  ;;  %v1035_v5 = vld [vmem:[%s1765_s6] sm:$0xf]  ;;  %v1719_v26 = vld [vmem:[%s1763_s4 + $0x8] sm:$0xff]  ;;  %v1199_v34 = vld [vmem:[%s1766_s7 + $0x10] sm:$0xff]  ;;  %s1248_s1 = smov 8  }
  0x38   :  { %v1036_v8 = vor.u32 %v1182_v6, %v1035_v5  ;;  %v153_v28 = vpack.c.bf16 %v1719_v26, %v1714_v25  ;;  %v1202_v31 = vld [vmem:[%s1766_s7 + $0x28] sm:$0xff]  ;;  %v1201_v32 = vld [vmem:[%s1766_s7 + $0x20] sm:$0xff] }
  0x39   :  { %541 = vmatpush.bf16.msrb.mxu0 %v900_v33  ;;  %v1200_v33 = vld [vmem:[%s1766_s7 + $0x18] sm:$0xff]  ;;  %v1198_v36 = vld [vmem:[%s1766_s7 + $0x8] sm:$0xff]  ;;  %v218_v37 = vld [vmem:[%s1767_s8] sm:$0x7] }
  0x3a   :  { %556 = vmatpush.bf16.msrb.mxu1 %v984_v15  ;;  %v221_v38 = vperm.slane %v218_v37, 1  ;;  %v220_v1 = vperm.slane %v218_v37, 0 }
  0x3b   :  { %680 = vmatpush.bf16.msra.mxu3 %v1064_v17  ;;  %665 = vmatpush.bf16.msra.mxu2 %v1068_v35 }
  0x3d   :  { %542 = vmatpush.bf16.msrb.mxu0 %v888_v45 }
  0x3e   :  { %557 = vmatpush.bf16.msrb.mxu1 %v972_v27 }
  0x3f   :  { %681 = vmatpush.bf16.msra.mxu3 %v1056_v29  ;;  %666 = vmatpush.bf16.msra.mxu2 %v1060_v47  ;;  %v1204_v29 = vld [vmem:[%s1766_s7 + $0x38] sm:$0xff] }
  0x41   :  { %543 = vmatpush.bf16.msrb.mxu0 %v876_v56 }
  0x42   :  { %558 = vmatpush.bf16.msrb.mxu1 %v960_v39  ;;  %v1197_v39 = vld [vmem:[%s1766_s7] sm:$0xff]  ;;  %s1246_s7 = smov [#allocation2]  }
  0x43   :  { %682 = vmatpush.bf16.msra.mxu3 %v1048_v41  ;;  %667 = vmatpush.bf16.msra.mxu2 %v1052_v59  ;;  %s807_s8 = sshll.u32 %s1246_s7, 4  ;;  %s808_s8 = int_to_ptr.vmem [resolvable:$true] %s807_s8 }
  0x45   :  { %544 = vmatpush.bf16.msrb.mxu0 %v864_v63 }
  0x46   :  { %559 = vmatpush.bf16.msrb.mxu1 %v948_v51 }
  0x47   :  { %683 = vmatpush.bf16.msra.mxu3 %v1040_v55  ;;  %668 = vmatpush.bf16.msra.mxu2 %v1044_v4 }
  0x49   :  { %545 = vmatpush.bf16.msrb.mxu0 %v852_v7 }
  0x4b   :  { %669 = vmatpush.bf16.msra.mxu2 %v1036_v8 }
  0x82   :  { %v59_v3 = vpop.f32.mrf.mxu1 }
  0x83   :  { %v135_v18 = vpack.c.bf16 %v59_v3, %v59_v3 }
  0x85   :  { %v141_v22 = vunpack.c.l.b16 %v135_v18 }
  0x88   :  { %v131_v11 = vpop.f32.mrf.mxu3 }
  0x89   :  { %v109_v9 = vpop.f32.mrf.mxu2  ;;  %v138_v12 = vpack.c.bf16 %v131_v11, %v131_v11 }
  0x8a   :  { %v137_v10 = vpack.c.bf16 %v109_v9, %v109_v9  ;;  %v61_v13 = vpop.f32.mrf.mxu1  ;;  %v222_v9 = vperm.slane %v218_v37, 2 }
  0x8b   :  { %v148_v15 = vunpack.c.l.b16 %v138_v12 }
  0x8c   :  { %v147_v14 = vunpack.c.l.b16 %v137_v10 }
  0x8e   :  { %v149_v16 = vpack.c.b16 %v148_v15, %v147_v14 }
  0x90   :  { %504 = vmatmul.bf16.vlgmr.msra.gmra.mxu1 %v149_v16  ;;  %532 = vmatmul.bf16.vlgmr.msrb.gmra.mxu3 %v149_v16  ;;  %v133_v19 = vpop.f32.mrf.mxu3 }
  0x91   :  { %v111_v17 = vpop.f32.mrf.mxu2 }
  0x92   :  { %v81_v20 = vpop.f32.mrf.mxu1 }
  0x93   :  { %v136_v21 = vpack.c.bf16 %v81_v20, %v81_v20 }
  0x95   :  { %v142_v23 = vunpack.c.l.b16 %v136_v21 }
  0x97   :  { %v143_v24 = vpack.c.b16 %v142_v23, %v141_v22 }
  0x99   :  { %490 = vmatmul.bf16.vlgmr.msra.gmra.mxu0 %v143_v24  ;;  %518 = vmatmul.bf16.vlgmr.msrb.gmra.mxu2 %v143_v24 }
  0x9a   :  { %v83_v27 = vpop.f32.mrf.mxu1  ;;  %777 = vmatpush.bf16.msra.mxu0 %v1204_v29 }
  0x9e   :  { %778 = vmatpush.bf16.msra.mxu0 %v1203_v30 }
  0xa0   :  { %560 = vmatmul.bf16.vlgmr.msrb.gmra.mxu1 %v149_v16  ;;  %684 = vmatmul.bf16.vlgmr.msra.gmra.mxu3 %v153_v28 }
  0xa2   :  { %779 = vmatpush.bf16.msra.mxu0 %v1202_v31 }
  0xa6   :  { %780 = vmatpush.bf16.msra.mxu0 %v1201_v32 }
  0xa9   :  { %546 = vmatmul.bf16.vlgmr.msrb.gmra.mxu0 %v143_v24  ;;  %670 = vmatmul.bf16.vlgmr.msra.gmra.mxu2 %v153_v28 }
  0xaa   :  { %781 = vmatpush.bf16.msra.mxu0 %v1200_v33 }
  0xae   :  { %782 = vmatpush.bf16.msra.mxu0 %v1199_v34 }
  0xb2   :  { %783 = vmatpush.bf16.msra.mxu0 %v1198_v36 }
  0xb6   :  { %784 = vmatpush.bf16.msra.mxu0 %v1197_v39 }
 0x10d   :  { %v505_v0 = vpop.f32.mrf.mxu1 }
 0x113   :  { %v533_v35 = vpop.f32.mrf.mxu3 }
 0x115   :  { %v507_v5 = vpop.f32.mrf.mxu1 }
 0x116   :  { %v491_v62 = vpop.f32.mrf.mxu0 }
 0x117   :  { %v492_v3 = vadd.f32 %v491_v62, %v220_v1 }
 0x119   :  { %v506_v6 = vadd.f32 %v505_v0, %v492_v3 }
 0x11b   :  { %v535_v40 = vpop.f32.mrf.mxu3 }
 0x11c   :  { %v519_v41 = vpop.f32.mrf.mxu2 }
 0x11d   :  { %v520_v42 = vadd.f32 %v519_v41, %v221_v38  ;;  %v561_v15 = vpop.f32.mrf.mxu1 }
 0x11e   :  { %v493_v63 = vpop.f32.mrf.mxu0 }
 0x11f   :  { %v534_v43 = vadd.f32 %v533_v35, %v520_v42  ;;  %v494_v8 = vadd.f32 %v493_v63, %v220_v1 }
 0x121   :  { %v508_v14 = vadd.f32 %v507_v5, %v494_v8 }
 0x123   :  { %v685_v44 = vpop.f32.mrf.mxu3 }
 0x124   :  { %v691_v45 = vadd.f32 %v685_v44, %v534_v43  ;;  %v521_v46 = vpop.f32.mrf.mxu2 }
 0x125   :  { %v522_v48 = vadd.f32 %v521_v46, %v221_v38  ;;  %v563_v23 = vpop.f32.mrf.mxu1 }
 0x126   :  { %v702_v47 = vmul.f32 0.5, %v691_v45  ;;  %v547_v2 = vpop.f32.mrf.mxu0 }
 0x127   :  { %v536_v49 = vadd.f32 %v535_v40, %v522_v48  ;;  %v548_v13 = vadd.f32 %v547_v2, %v222_v9 }
 0x128   :  { %1208 = vtanh.f32 %v702_v47 }
 0x129   :  { %v562_v17 = vadd.f32 %v561_v15, %v548_v13 }
 0x12b   :  { %v687_v50 = vpop.f32.mrf.mxu3 }
 0x12c   :  { %v693_v51 = vadd.f32 %v687_v50, %v536_v49  ;;  %v671_v4 = vpop.f32.mrf.mxu2 }
 0x12d   :  { %v690_v7 = vadd.f32 %v671_v4, %v506_v6 }
 0x12e   :  { %v703_v52 = vmul.f32 0.5, %v693_v51  ;;  %v1209_v53 = vpop.eup %1208  ;;  %v549_v10 = vpop.f32.mrf.mxu0 }
 0x12f   :  { %v706_v54 = vmul.f32 0.5, %v1209_v53  ;;  %v694_v11 = vmul.f32 0.5, %v690_v7  ;;  %v550_v22 = vadd.f32 %v549_v10, %v222_v9 }
 0x130   :  { %1210 = vtanh.f32 %v703_v52 }
 0x131   :  { %v708_v56 = vadd.f32 0.5, %v706_v54  ;;  %1212 = vtanh.f32 %v694_v11  ;;  %v564_v27 = vadd.f32 %v563_v23, %v550_v22 }
 0x133   :  { %v710_v59 = vmul.f32 %v708_v56, %v1714_v25 }
 0x134   :  { %v673_v12 = vpop.f32.mrf.mxu2 }
 0x135   :  { %v692_v16 = vadd.f32 %v673_v12, %v508_v14 }
 0x136   :  { %v1211_v55 = vpop.eup %1210 }
 0x137   :  { %v707_v57 = vmul.f32 0.5, %v1211_v55  ;;  %v695_v19 = vmul.f32 0.5, %v692_v16  ;;  %v1213_v21 = vpop.eup %1212 }
 0x138   :  { %v698_v24 = vmul.f32 0.5, %v1213_v21 }
 0x139   :  { %v709_v58 = vadd.f32 0.5, %v707_v57 }
 0x13a   :  { %v700_v31 = vadd.f32 0.5, %v698_v24 }
 0x13b   :  { %v711_v60 = vmul.f32 %v709_v58, %v1719_v26 }
 0x13d   :  { %v712_v61 = vpack.c.bf16 %v711_v60, %v710_v59 }
 0x13f   :  { %785 = vmatmul.bf16.vlgmr.msra.gmra.mxu0 %v712_v61 }
 0x1bc   :  { %v786_v18 = vpop.f32.mrf.mxu0 }
 0x1bd   :  { %v791_v20 = vadd.f32 %v786_v18, %v562_v17 }
 0x1bf   :  { %1214 = vtanh.f32 %v791_v20 }
 0x1c0   :  { %1216 = vtanh.f32 %v695_v19 }
 0x1c4   :  { %v788_v28 = vpop.f32.mrf.mxu0 }
 0x1c5   :  { %v1215_v29 = vpop.eup %1214  ;;  %v792_v30 = vadd.f32 %v788_v28, %v564_v27 }
 0x1c6   :  { %v795_v32 = vsub.f32 %v1215_v29, %v1714_v25  ;;  %v1217_v33 = vpop.eup %1216 }
 0x1c7   :  { %1218 = vtanh.f32 %v792_v30  ;;  %v699_v35 = vmul.f32 0.5, %v1217_v33 }
 0x1c8   :  { %v797_v34 = vmul.f32 %v795_v32, %v700_v31 }
 0x1c9   :  { %v701_v38 = vadd.f32 0.5, %v699_v35 }
 0x1ca   :  { %v799_v36 = vadd.f32 %v797_v34, %v1714_v25 }
 0x1cc   :  { %801 = vst [vmem:[#allocation2] sm:$0xff] %v799_v36 }
 0x1cd   :  { %v1219_v37 = vpop.eup %1218 }
 0x1ce   :  { %v796_v39 = vsub.f32 %v1219_v37, %v1719_v26 }
 0x1d0   :  { %v798_v40 = vmul.f32 %v796_v39, %v701_v38 }
 0x1d2   :  { %v800_v41 = vadd.f32 %v798_v40, %v1719_v26 }
 0x1d4   :  { %802 = vst [vmem:[#allocation2 + $0x8] sm:$0xff] %v800_v41 }
 0x1d5   :  { %815 = dma.vmem_to_hbm [thread:$0]  %s808_s8, 256, %s810_s29, [#allocation3], %s1247_s0, %s1247_s0, %s1248_s1  }
 0x1d6   :  { %1244 = dma.done.wait [#allocation3], 256  }
 0x1d7   :  { %1245 = vsyncadd [#allocation3], 4294967040 }
 0x1d8   :  { %820 = vsyncpa [#allocation3], 1 }

</bundles_post_ra>
